<compile_context>
chip_gen: v6e
topology: v6e:2x2x1
jax: 0.10.0
libtpu: 0.0.40
codegen_flags: <defaults>
</compile_context>

<pallas_src>
import jax
import jax.numpy as jnp
from jax.experimental import pallas as pl
from jax.experimental.pallas import tpu as pltpu

EPS = 1e-5                       # nn.BatchNorm2d default eps
MATMUL_DTYPE = jnp.bfloat16      # MXU operand dtype (accumulation stays f32)


# --------------------------------- kernel ----------------------------------

def _make_double_conv_kernel(H, share_m):
    """Builds the fused kernel body. H = image height (static); share_m selects
    whether a single group-mean matrix is reused for both BN layers."""

    def kernel(*refs):
        if share_m:
            (x_ref, e1_ref, g1_ref, b1_ref,
             e2_ref, g2_ref, b2_ref, m_ref, o_ref) = refs
            m1_ref, m2_ref = m_ref, m_ref
        else:
            (x_ref, e1_ref, g1_ref, b1_ref,
             e2_ref, g2_ref, b2_ref, m1_ref, m2_ref, o_ref) = refs

        R = x_ref.shape[0]                                     # N*H packed rows
        h_idx = jax.lax.broadcasted_iota(jnp.int32, (R, 1), 0) % H
        not_top = h_idx != 0            # row h-1 exists within the same image
        not_bot = h_idx != (H - 1)      # row h+1 exists within the same image

        def ds_conv_bn_relu(x, e_ref, m_ref, g_ref, b_ref):
            # Depthwise 3x3 (padding=1) + pointwise 1x1 as ONE MXU matmul:
            # vertical halo via sublane rolls + boundary masks, horizontal taps
            # and pointwise mixing folded offline into e_ref (banded, stacked).
            xu = jnp.where(not_top, pltpu.roll(x, 1, axis=0), 0.0)      # x[r-1]
            xd = jnp.where(not_bot, pltpu.roll(x, R - 1, axis=0), 0.0)  # x[r+1]
            lhs = jnp.concatenate([xu, x, xd], axis=1).astype(MATMUL_DTYPE)
            h = jnp.dot(lhs, e_ref[...], preferred_element_type=jnp.float32)

            # BatchNorm2d, training-mode batch stats (biased variance), in f32.
            # Row-sums of h and h*h are stacked into one (2, W*C) LHS; a single
            # small stats matmul both averages per channel and re-broadcasts
            # the per-channel value to every (w, c) lane.
            ssum = jnp.sum(h, axis=0, keepdims=True)
            ssq = jnp.sum(h * h, axis=0, keepdims=True)
            stats = jnp.dot(jnp.concatenate([ssum, ssq], axis=0), m_ref[...],
                            preferred_element_type=jnp.float32)         # (2, W*C)
            mean = stats[0:1, :]
            var = jnp.maximum(stats[1:2, :] - mean * mean, 0.0)
            scale = g_ref[...] * jax.lax.rsqrt(var + EPS)
            shift = b_ref[...] - mean * scale
            return jnp.maximum(h * scale + shift, 0.0)                  # ReLU

        h1 = ds_conv_bn_relu(x_ref[...], e1_ref, m1_ref, g1_ref, b1_ref)
        o_ref[...] = ds_conv_bn_relu(h1, e2_ref, m2_ref, g2_ref, b2_ref)

    return kernel


# --------------------------- wrapper-side packing ---------------------------

def _fused_dw_pw_mat(dw_w, pw_w, W):
    """Stacked (3*W*Cin, W*Cout) matrix fusing the depthwise 3x3 (padding=1)
    with the 1x1 pointwise conv.  Rows [dy*W*Cin : (dy+1)*W*Cin] hold the dy-th
    kernel-row band:
        E[dy*W*Cin + w*Cin + ci, v*Cout + co] = dw[ci, dy, w-v+1] * pw[co, ci]
    for |w - v| <= 1, else 0."""
    taps = dw_w[:, 0].astype(jnp.float32)                               # (Cin, 3, 3)
    pw = jnp.transpose(pw_w[:, :, 0, 0], (1, 0)).astype(jnp.float32)    # (Cin, Cout)
    cin, cout = pw.shape
    wi = jnp.arange(W)
    dx = wi[:, None] - wi[None, :] + 1                                  # (W_in, W_out)
    valid = ((dx >= 0) & (dx <= 2)).astype(jnp.float32)
    dxc = jnp.clip(dx, 0, 2)
    mats = []
    for dy in range(3):
        tw = taps[:, dy, :][:, dxc] * valid[None]                       # (Cin, W, W)
        mats.append(jnp.einsum('cwv,co->wcvo', tw, pw).reshape(W * cin, W * cout))
    return jnp.concatenate(mats, axis=0).astype(MATMUL_DTYPE)


def _group_mean_matrix(C, W, count):
    """M[l, l'] = 1/count iff lanes l, l' carry the same channel (l % C)."""
    ch = jnp.arange(W * C) % C
    return (ch[:, None] == ch[None, :]).astype(jnp.float32) / float(count)


def _tile_lanes(v, W):
    return jnp.tile(v.astype(jnp.float32), W).reshape(1, -1)   # lane (w, c) -> v[c]


def double_conv_ds_packed(x_packed, params, *, H, W):
    """Fused DoubleConvDS on the lane-packed layout.
    x_packed: (N*H, W*Cin) f32, lane index = w*Cin + ci  ->  (N*H, W*Cout) f32.
    Keep this layout through the surrounding model; the NCHW adapter below only
    exists to honour the PyTorch interface."""
    R = x_packed.shape[0]
    Cmid = params["pw1_w"].shape[0]
    Cout = params["pw2_w"].shape[0]
    N = R // H
    count = N * H * W                                   # BN reduces over (N, H, W)

    e1 = _fused_dw_pw_mat(params["dw1_w"], params["pw1_w"], W)   # (3*W*Cin,  W*Cmid)
    e2 = _fused_dw_pw_mat(params["dw2_w"], params["pw2_w"], W)   # (3*W*Cmid, W*Cout)
    g1 = _tile_lanes(params["bn1_g"], W)
    b1 = _tile_lanes(params["bn1_b"], W)
    g2 = _tile_lanes(params["bn2_g"], W)
    b2 = _tile_lanes(params["bn2_b"], W)
    # NOTE: conv biases (dw*_b / pw*_b) intentionally NOT passed: training-mode
    # BatchNorm subtracts the batch mean, which cancels any per-channel constant.

    share_m = (Cmid == Cout)          # group-mean matrix dedup (module default)
    args = [x_packed.astype(jnp.float32), e1, g1, b1, e2, g2, b2,
            _group_mean_matrix(Cmid, W, count)]
    if not share_m:
        args.append(_group_mean_matrix(Cout, W, count))

    # TODO(synk): at large N*H (and on v7x's 64 MiB VMEM) switch to a row-tiled
    #   "parallel" grid with two-pass BatchNorm (accumulate / finalize under
    #   pl.when) and an explicit vmem_limit_bytes; this gridless single
    #   invocation targets the tiny shapes this module is instantiated with.
    return pl.pallas_call(
        _make_double_conv_kernel(H, share_m),
        out_shape=jax.ShapeDtypeStruct((R, W * Cout), jnp.float32),
        in_specs=[pl.BlockSpec(memory_space=pltpu.MemorySpace.VMEM)] * len(args),
        out_specs=pl.BlockSpec(memory_space=pltpu.MemorySpace.VMEM),
    )(*args)


@jax.jit
def double_conv_ds(x_nchw, params):
    """NCHW adapter matching the PyTorch interface: (N,Cin,H,W) -> (N,Cout,H,W)."""
    N, Cin, H, W = x_nchw.shape
    Cout = params["pw2_w"].shape[0]
    x = jnp.transpose(x_nchw, (0, 2, 3, 1)).astype(jnp.float32).reshape(N * H, W * Cin)
    y = double_conv_ds_packed(x, params, H=H, W=W)
    return jnp.transpose(y.reshape(N, H, W, Cout), (0, 3, 1, 2))


# ------------------------------ params / reference ------------------------------

def init_double_conv_ds_params(key, in_channels, out_channels, mid_channels=None):
    if not mid_channels:
        mid_channels = out_channels
    ks = jax.random.split(key, 12)

    def w(k, shape, s=0.2):
        return (s * jax.random.normal(k, shape)).astype(jnp.float32)

    return dict(
        dw1_w=w(ks[0], (in_channels, 1, 3, 3)),
        dw1_b=w(ks[1], (in_channels,), 0.1),
        pw1_w=w(ks[2], (mid_channels, in_channels, 1, 1)),
        pw1_b=w(ks[3], (mid_channels,), 0.1),
        bn1_g=(1.0 + w(ks[4], (mid_channels,), 0.1)),
        bn1_b=w(ks[5], (mid_channels,), 0.1),
        dw2_w=w(ks[6], (mid_channels, 1, 3, 3)),
        dw2_b=w(ks[7], (mid_channels,), 0.1),
        pw2_w=w(ks[8], (out_channels, mid_channels, 1, 1)),
        pw2_b=w(ks[9], (out_channels,), 0.1),
        bn2_g=(1.0 + w(ks[10], (out_channels,), 0.1)),
        bn2_b=w(ks[11], (out_channels,), 0.1),
    )


def reference_double_conv_ds(x, p):
    """Pure-JAX (XLA) NCHW reference matching the PyTorch forward (biases included)."""
    def ds(x, dw_w, dw_b, pw_w, pw_b):
        cin = x.shape[1]
        y = jax.lax.conv_general_dilated(
            x, dw_w, (1, 1), ((1, 1), (1, 1)),
            dimension_numbers=("NCHW", "OIHW", "NCHW"),
            feature_group_count=cin, precision=jax.lax.Precision.HIGHEST)
        y = y + dw_b[None, :, None, None]
        y = jax.lax.conv_general_dilated(
            y, pw_w, (1, 1), ((0, 0), (0, 0)),
            dimension_numbers=("NCHW", "OIHW", "NCHW"),
            precision=jax.lax.Precision.HIGHEST)
        return y + pw_b[None, :, None, None]

    def bn_relu(x, g, b):
        m = jnp.mean(x, axis=(0, 2, 3), keepdims=True)
        v = jnp.mean((x - m) ** 2, axis=(0, 2, 3), keepdims=True)
        y = (x - m) * jax.lax.rsqrt(v + EPS)
        y = y * g[None, :, None, None] + b[None, :, None, None]
        return jnp.maximum(y, 0.0)

    h = bn_relu(ds(x, p["dw1_w"], p["dw1_b"], p["pw1_w"], p["pw1_b"]),
                p["bn1_g"], p["bn1_b"])
    h = bn_relu(ds(h, p["dw2_w"], p["dw2_b"], p["pw2_w"], p["pw2_b"]),
                p["bn2_g"], p["bn2_b"])
    return h


if __name__ == "__main__":
    key = jax.random.PRNGKey(0)
    k_x, k_p = jax.random.split(key)

    N, Cin, H, W = 2, 4, 16, 16
    Cout = 8  # mid_channels defaults to out_channels

    x = jax.random.normal(k_x, (N, Cin, H, W), jnp.float32)
    params = init_double_conv_ds_params(k_p, Cin, Cout)

    y = jax.block_until_ready(double_conv_ds(x, params))
    assert y.shape == (N, Cout, H, W), y.shape

    y_ref = reference_double_conv_ds(x, params)
    # bf16 MXU operands across two fused conv layers -> widen tolerance vs the
    # f32 kernel's 2e-3 (BN statistics / normalization stay in f32).
    tol = 2e-3 if MATMUL_DTYPE == jnp.float32 else 3e-2
    max_err = float(jnp.max(jnp.abs(y - y_ref)))
    if not jnp.allclose(y, y_ref, atol=tol, rtol=tol):
        raise AssertionError(f"Pallas kernel mismatch vs reference, max_err={max_err}")

    print("KERNEL_OK")
</pallas_src>

<mosaic_0001>
module attributes {stable_mosaic.version = 11 : i64} {
  func.func @kernel(%arg0: memref<32x64xf32, #tpu.memory_space<vmem>>, %arg1: memref<192x128xbf16, #tpu.memory_space<vmem>>, %arg2: memref<1x128xf32, #tpu.memory_space<vmem>>, %arg3: memref<1x128xf32, #tpu.memory_space<vmem>>, %arg4: memref<384x128xbf16, #tpu.memory_space<vmem>>, %arg5: memref<1x128xf32, #tpu.memory_space<vmem>>, %arg6: memref<1x128xf32, #tpu.memory_space<vmem>>, %arg7: memref<128x128xf32, #tpu.memory_space<vmem>>, %arg8: memref<32x128xf32, #tpu.memory_space<vmem>>) attributes {dimension_semantics = [], scalar_prefetch = 0 : i64, scratch_operands = 0 : i64, tpu.core_type = #tpu.core_type<tc>} {
    %0 = tpu.iota {dimensions = array<i32: 0>} : vector<32x1xi32>
    %c16_i32 = arith.constant 16 : i32
    %c0_i32 = arith.constant 0 : i32
    %1 = arith.cmpi eq, %c16_i32, %c0_i32 : i32
    %c1_i32 = arith.constant 1 : i32
    %2 = arith.select %1, %c1_i32, %c16_i32 : i32
    %3 = vector.broadcast %2 : i32 to vector<32x1xi32>
    %4 = arith.remsi %0, %3 : vector<32x1xi32>
    %c0_i32_0 = arith.constant 0 : i32
    %5 = vector.broadcast %c0_i32_0 : i32 to vector<32x1xi32>
    %6 = arith.cmpi ne, %4, %5 : vector<32x1xi32>
    %c0_i32_1 = arith.constant 0 : i32
    %7 = vector.broadcast %c0_i32_1 : i32 to vector<32x1xi32>
    %8 = arith.cmpi slt, %4, %7 : vector<32x1xi32>
    %c0_i32_2 = arith.constant 0 : i32
    %9 = arith.cmpi slt, %2, %c0_i32_2 : i32
    %10 = vector.broadcast %9 : i1 to vector<32x1xi1>
    %11 = vector.broadcast %10 : vector<32x1xi1> to vector<32x1xi1>
    %12 = arith.xori %8, %11 : vector<32x1xi1>
    %13 = arith.andi %12, %6 : vector<32x1xi1>
    %14 = vector.broadcast %2 : i32 to vector<32x1xi32>
    %15 = arith.addi %4, %14 : vector<32x1xi32>
    %16 = arith.select %13, %15, %4 : vector<32x1xi1>, vector<32x1xi32>
    %c0_i32_3 = arith.constant 0 : i32
    %17 = vector.broadcast %c0_i32_3 : i32 to vector<32x1xi32>
    %18 = arith.cmpi ne, %16, %17 : vector<32x1xi32>
    %c15_i32 = arith.constant 15 : i32
    %19 = vector.broadcast %c15_i32 : i32 to vector<32x1xi32>
    %20 = arith.cmpi ne, %16, %19 : vector<32x1xi32>
    %c0 = arith.constant 0 : index
    %c0_4 = arith.constant 0 : index
    %21 = vector.load %arg0[%c0, %c0_4] : memref<32x64xf32, #tpu.memory_space<vmem>>, vector<32x64xf32>
    %c1_i32_5 = arith.constant 1 : i32
    %22 = tpu.dynamic_rotate %21 by %c1_i32_5 dim 0 : vector<32x64xf32>, i32 -> vector<32x64xf32>
    %cst = arith.constant 0.000000e+00 : f32
    %23 = vector.shape_cast %18 : vector<32x1xi1> to vector<32x1xi1>
    %24 = vector.broadcast %23 : vector<32x1xi1> to vector<32x64xi1>
    %25 = vector.broadcast %cst : f32 to vector<32x64xf32>
    %26 = arith.select %24, %22, %25 : vector<32x64xi1>, vector<32x64xf32>
    %c31_i32 = arith.constant 31 : i32
    %27 = tpu.dynamic_rotate %21 by %c31_i32 dim 0 : vector<32x64xf32>, i32 -> vector<32x64xf32>
    %cst_6 = arith.constant 0.000000e+00 : f32
    %28 = vector.shape_cast %20 : vector<32x1xi1> to vector<32x1xi1>
    %29 = vector.broadcast %28 : vector<32x1xi1> to vector<32x64xi1>
    %30 = vector.broadcast %cst_6 : f32 to vector<32x64xf32>
    %31 = arith.select %29, %27, %30 : vector<32x64xi1>, vector<32x64xf32>
    %32 = tpu.concatenate %26, %21, %31 in 1 : vector<32x64xf32>, vector<32x64xf32>, vector<32x64xf32> -> vector<32x192xf32>
    %33 = arith.truncf %32 : vector<32x192xf32> to vector<32x192xbf16>
    %c0_7 = arith.constant 0 : index
    %c0_8 = arith.constant 0 : index
    %34 = vector.load %arg1[%c0_7, %c0_8] : memref<192x128xbf16, #tpu.memory_space<vmem>>, vector<192x128xbf16>
    %cst_9 = arith.constant dense<0.000000e+00> : vector<32x128xf32>
    %35 = tpu.matmul %33, %34, %cst_9 {dimension_numbers = #tpu.dot_dimension_numbers<[1], [0], [0], [1], [0, 0, 1, 1], [], []>} : vector<32x192xbf16>, vector<192x128xbf16>, vector<32x128xf32> -> vector<32x128xf32>
    %cst_10 = arith.constant dense<0.000000e+00> : vector<128xf32>
    %36 = vector.multi_reduction <add>, %35, %cst_10 [0] : vector<32x128xf32> to vector<128xf32>
    %37 = vector.shape_cast %36 : vector<128xf32> to vector<1x128xf32>
    %38 = arith.mulf %35, %35 : vector<32x128xf32>
    %cst_11 = arith.constant dense<0.000000e+00> : vector<128xf32>
    %39 = vector.multi_reduction <add>, %38, %cst_11 [0] : vector<32x128xf32> to vector<128xf32>
    %40 = vector.shape_cast %39 : vector<128xf32> to vector<1x128xf32>
    %41 = tpu.concatenate %37, %40 in 0 : vector<1x128xf32>, vector<1x128xf32> -> vector<2x128xf32>
    %c0_12 = arith.constant 0 : index
    %c0_13 = arith.constant 0 : index
    %42 = vector.load %arg7[%c0_12, %c0_13] : memref<128x128xf32, #tpu.memory_space<vmem>>, vector<128x128xf32>
    %cst_14 = arith.constant dense<0.000000e+00> : vector<2x128xf32>
    %43 = tpu.matmul %41, %42, %cst_14 {dimension_numbers = #tpu.dot_dimension_numbers<[1], [0], [0], [1], [0, 0, 1, 1], [], []>} : vector<2x128xf32>, vector<128x128xf32>, vector<2x128xf32> -> vector<2x128xf32>
    %44 = vector.extract_strided_slice %43 {offsets = [0, 0], sizes = [1, 128], strides = [1, 1]} : vector<2x128xf32> to vector<1x128xf32>
    %45 = vector.extract_strided_slice %43 {offsets = [1, 0], sizes = [1, 128], strides = [1, 1]} : vector<2x128xf32> to vector<1x128xf32>
    %46 = arith.mulf %44, %44 : vector<1x128xf32>
    %47 = arith.subf %45, %46 : vector<1x128xf32>
    %cst_15 = arith.constant 0.000000e+00 : f32
    %48 = vector.broadcast %cst_15 : f32 to vector<1x128xf32>
    %49 = arith.maximumf %47, %48 : vector<1x128xf32>
    %c0_16 = arith.constant 0 : index
    %c0_17 = arith.constant 0 : index
    %50 = vector.load %arg2[%c0_16, %c0_17] : memref<1x128xf32, #tpu.memory_space<vmem>>, vector<1x128xf32>
    %cst_18 = arith.constant 9.99999974E-6 : f32
    %51 = vector.broadcast %cst_18 : f32 to vector<1x128xf32>
    %52 = arith.addf %49, %51 : vector<1x128xf32>
    %53 = math.rsqrt %52 : vector<1x128xf32>
    %54 = arith.mulf %50, %53 : vector<1x128xf32>
    %c0_19 = arith.constant 0 : index
    %c0_20 = arith.constant 0 : index
    %55 = vector.load %arg3[%c0_19, %c0_20] : memref<1x128xf32, #tpu.memory_space<vmem>>, vector<1x128xf32>
    %56 = arith.mulf %44, %54 : vector<1x128xf32>
    %57 = arith.subf %55, %56 : vector<1x128xf32>
    %58 = vector.broadcast %54 : vector<1x128xf32> to vector<32x128xf32>
    %59 = arith.mulf %35, %58 : vector<32x128xf32>
    %60 = vector.broadcast %57 : vector<1x128xf32> to vector<32x128xf32>
    %61 = arith.addf %59, %60 : vector<32x128xf32>
    %cst_21 = arith.constant 0.000000e+00 : f32
    %62 = vector.broadcast %cst_21 : f32 to vector<32x128xf32>
    %63 = arith.maximumf %61, %62 : vector<32x128xf32>
    %c1_i32_22 = arith.constant 1 : i32
    %64 = tpu.dynamic_rotate %63 by %c1_i32_22 dim 0 : vector<32x128xf32>, i32 -> vector<32x128xf32>
    %cst_23 = arith.constant 0.000000e+00 : f32
    %65 = vector.shape_cast %18 : vector<32x1xi1> to vector<32x1xi1>
    %66 = vector.broadcast %65 : vector<32x1xi1> to vector<32x128xi1>
    %67 = vector.broadcast %cst_23 : f32 to vector<32x128xf32>
    %68 = arith.select %66, %64, %67 : vector<32x128xi1>, vector<32x128xf32>
    %c31_i32_24 = arith.constant 31 : i32
    %69 = tpu.dynamic_rotate %63 by %c31_i32_24 dim 0 : vector<32x128xf32>, i32 -> vector<32x128xf32>
    %cst_25 = arith.constant 0.000000e+00 : f32
    %70 = vector.shape_cast %20 : vector<32x1xi1> to vector<32x1xi1>
    %71 = vector.broadcast %70 : vector<32x1xi1> to vector<32x128xi1>
    %72 = vector.broadcast %cst_25 : f32 to vector<32x128xf32>
    %73 = arith.select %71, %69, %72 : vector<32x128xi1>, vector<32x128xf32>
    %74 = tpu.concatenate %68, %63, %73 in 1 : vector<32x128xf32>, vector<32x128xf32>, vector<32x128xf32> -> vector<32x384xf32>
    %75 = arith.truncf %74 : vector<32x384xf32> to vector<32x384xbf16>
    %c0_26 = arith.constant 0 : index
    %c0_27 = arith.constant 0 : index
    %76 = vector.load %arg4[%c0_26, %c0_27] : memref<384x128xbf16, #tpu.memory_space<vmem>>, vector<384x128xbf16>
    %cst_28 = arith.constant dense<0.000000e+00> : vector<32x128xf32>
    %77 = tpu.matmul %75, %76, %cst_28 {dimension_numbers = #tpu.dot_dimension_numbers<[1], [0], [0], [1], [0, 0, 1, 1], [], []>} : vector<32x384xbf16>, vector<384x128xbf16>, vector<32x128xf32> -> vector<32x128xf32>
    %cst_29 = arith.constant dense<0.000000e+00> : vector<128xf32>
    %78 = vector.multi_reduction <add>, %77, %cst_29 [0] : vector<32x128xf32> to vector<128xf32>
    %79 = vector.shape_cast %78 : vector<128xf32> to vector<1x128xf32>
    %80 = arith.mulf %77, %77 : vector<32x128xf32>
    %cst_30 = arith.constant dense<0.000000e+00> : vector<128xf32>
    %81 = vector.multi_reduction <add>, %80, %cst_30 [0] : vector<32x128xf32> to vector<128xf32>
    %82 = vector.shape_cast %81 : vector<128xf32> to vector<1x128xf32>
    %83 = tpu.concatenate %79, %82 in 0 : vector<1x128xf32>, vector<1x128xf32> -> vector<2x128xf32>
    %c0_31 = arith.constant 0 : index
    %c0_32 = arith.constant 0 : index
    %84 = vector.load %arg7[%c0_31, %c0_32] : memref<128x128xf32, #tpu.memory_space<vmem>>, vector<128x128xf32>
    %cst_33 = arith.constant dense<0.000000e+00> : vector<2x128xf32>
    %85 = tpu.matmul %83, %84, %cst_33 {dimension_numbers = #tpu.dot_dimension_numbers<[1], [0], [0], [1], [0, 0, 1, 1], [], []>} : vector<2x128xf32>, vector<128x128xf32>, vector<2x128xf32> -> vector<2x128xf32>
    %86 = vector.extract_strided_slice %85 {offsets = [0, 0], sizes = [1, 128], strides = [1, 1]} : vector<2x128xf32> to vector<1x128xf32>
    %87 = vector.extract_strided_slice %85 {offsets = [1, 0], sizes = [1, 128], strides = [1, 1]} : vector<2x128xf32> to vector<1x128xf32>
    %88 = arith.mulf %86, %86 : vector<1x128xf32>
    %89 = arith.subf %87, %88 : vector<1x128xf32>
    %cst_34 = arith.constant 0.000000e+00 : f32
    %90 = vector.broadcast %cst_34 : f32 to vector<1x128xf32>
    %91 = arith.maximumf %89, %90 : vector<1x128xf32>
    %c0_35 = arith.constant 0 : index
    %c0_36 = arith.constant 0 : index
    %92 = vector.load %arg5[%c0_35, %c0_36] : memref<1x128xf32, #tpu.memory_space<vmem>>, vector<1x128xf32>
    %cst_37 = arith.constant 9.99999974E-6 : f32
    %93 = vector.broadcast %cst_37 : f32 to vector<1x128xf32>
    %94 = arith.addf %91, %93 : vector<1x128xf32>
    %95 = math.rsqrt %94 : vector<1x128xf32>
    %96 = arith.mulf %92, %95 : vector<1x128xf32>
    %c0_38 = arith.constant 0 : index
    %c0_39 = arith.constant 0 : index
    %97 = vector.load %arg6[%c0_38, %c0_39] : memref<1x128xf32, #tpu.memory_space<vmem>>, vector<1x128xf32>
    %98 = arith.mulf %86, %96 : vector<1x128xf32>
    %99 = arith.subf %97, %98 : vector<1x128xf32>
    %100 = vector.broadcast %96 : vector<1x128xf32> to vector<32x128xf32>
    %101 = arith.mulf %77, %100 : vector<32x128xf32>
    %102 = vector.broadcast %99 : vector<1x128xf32> to vector<32x128xf32>
    %103 = arith.addf %101, %102 : vector<32x128xf32>
    %cst_40 = arith.constant 0.000000e+00 : f32
    %104 = vector.broadcast %cst_40 : f32 to vector<32x128xf32>
    %105 = arith.maximumf %103, %104 : vector<32x128xf32>
    %c0_41 = arith.constant 0 : index
    %c0_42 = arith.constant 0 : index
    %106 = vector.load %arg8[%c0_41, %c0_42] : memref<32x128xf32, #tpu.memory_space<vmem>>, vector<32x128xf32>
    tpu.vector_store %arg8[%c0_41, %c0_42], %105 {strides = array<i32>} : memref<32x128xf32, #tpu.memory_space<vmem>>, vector<32x128xf32>,
    return
  }
}

</mosaic_0001>

<bundles_post_ra>
// kernel: tile.23
= control target key start
LH: loop header
LB: loop body
LE: loop exit
PB: predicated region body
PF: predicated region fallthrough
CT: control target
= control target key end

     0   :  { %s28_s0 = inlined_call_operand.vmem [shape: f32[8], index: 0, kind: input, shape index: {}]   ;;  %s29_s1 = inlined_call_operand.vmem [shape: f32[16,8], index: 1, kind: output, shape index: {}]  }
   0x1   :  { %v4_v0 = vld [vmem:[%s28_s0] ss:$0 sm:$0xff] }
   0x2   :  { %5 = vst [vmem:[%s29_s1] sm:$0xff] %v4_v0  ;;  %8 = vst [vmem:[%s29_s1 + $0x8] sm:$0xff] %v4_v0 }

// kernel: tile.24
= control target key start
LH: loop header
LB: loop body
LE: loop exit
PB: predicated region body
PF: predicated region fallthrough
CT: control target
= control target key end

     0   :  { %s133_s10 = smov 120   ;;  %s134_s11 = smov 104   ;;  %vm3_vm0 = vcmask 64512   ;;  %vm9_vm1 = vcmask 1048512   ;;  %vm15_vm2 = vcmask 982912   ;;  %vm21_vm3 = vcmask 917312   ;;  %s209_s0 = inlined_call_operand.vmem [shape: f32[16,8], index: 0, kind: input, shape index: {}]   ;;  %s210_s1 = inlined_call_operand.vmem [shape: f32[1,128], index: 1, kind: output, shape index: {}]  }
   0x1   :  { %v103_v0 = vld [vmem:[%s209_s0 + $0xf] sm:$0x1]   ;;  %v105_v1 = vld [vmem:[%s209_s0 + $0xd] sm:$0x1]   ;;  %v104_v2 = vld [vmem:[%s209_s0 + $0xe] sm:$0x1]  }
   0x2   :  { %7 = vrot.lane.b32.xlu0 %v103_v0, %s133_s10  ;;  %19 = vrot.lane.b32.xlu1 %v105_v1, %s134_s11  ;;  %v106_v3 = vld [vmem:[%s209_s0 + $0xc] sm:$0x1]   ;;  %s135_s16 = smov 112   ;;  %s136_s17 = smov 96   ;;  %v107_v4 = vld [vmem:[%s209_s0 + $0xb] sm:$0x1]  }
   0x3   :  { %v108_v5 = vld [vmem:[%s209_s0 + $0xa] sm:$0x1]   ;;  %v2_v6 = vld [vmem:[%s209_s0] sm:$0x1]   ;;  %s137_s24 = smov 88   ;;  %s138_s25 = smov 80  }
   0x4   :  { %4 = vst.msk [vmem:[#allocation0] sm:$0x1] %vm3_vm0, %v2_v6   ;;  %v109_v7 = vld [vmem:[%s209_s0 + $0x9] sm:$0x1]   ;;  %v110_v8 = vld [vmem:[%s209_s0 + $0x8] sm:$0x1]  }
   0x5   :  { %s139_s30 = smov 72   ;;  %s140_s2 = smov 64   ;;  %v111_v9 = vld [vmem:[%s209_s0 + $0x7] sm:$0x1]   ;;  %v112_v10 = vld [vmem:[%s209_s0 + $0x6] sm:$0x1]  }
   0x6   :  { %13 = vrot.lane.b32.xlu0 %v104_v2, %s135_s16  ;;  %25 = vrot.lane.b32.xlu1 %v106_v3, %s136_s17  ;;  %s141_s7 = smov 56   ;;  %s142_s8 = smov 48   ;;  %v113_v11 = vld [vmem:[%s209_s0 + $0x5] sm:$0x1]   ;;  %v114_v12 = vld [vmem:[%s209_s0 + $0x4] sm:$0x1]  }
   0x7   :  { %s143_s13 = smov 40   ;;  %s144_s14 = smov 32   ;;  %v115_v13 = vld [vmem:[%s209_s0 + $0x3] sm:$0x1]   ;;  %v116_v14 = vld [vmem:[%s209_s0 + $0x2] sm:$0x1]  }
   0x8   :  { %s145_s19 = smov 24   ;;  %s146_s20 = smov 16   ;;  %v117_v15 = vld [vmem:[%s209_s0 + $0x1] sm:$0x1]   ;;  %vm27_vm4 = vcmask 851712   ;;  %vm33_vm5 = vcmask 786112  }
   0x9   :  { %s147_s0 = smov 8   ;;  %vm39_vm6 = vcmask 720512   ;;  %vm45_vm7 = vcmask 654912   ;;  %vm51_vm8 = vcmask 589312   ;;  %vm57_vm9 = vcmask 523712  }
   0xa   :  { %31 = vrot.lane.b32.xlu0 %v107_v4, %s137_s24  ;;  %37 = vrot.lane.b32.xlu1 %v108_v5, %s138_s25  ;;  %vm63_vm10 = vcmask 458112   ;;  %vm69_vm11 = vcmask 392512   ;;  %vm75_vm12 = vcmask 326912   ;;  %vm81_vm13 = vcmask 261312  }
   0xb   :  { %vm87_vm14 = vcmask 195712   ;;  %vm93_vm15 = vcmask 130112  }
   0xe   :  { %43 = vrot.lane.b32.xlu0 %v109_v7, %s139_s30  ;;  %49 = vrot.lane.b32.xlu1 %v110_v8, %s140_s2 }
  0x12   :  { %55 = vrot.lane.b32.xlu0 %v111_v9, %s141_s7  ;;  %61 = vrot.lane.b32.xlu1 %v112_v10, %s142_s8 }
  0x16   :  { %67 = vrot.lane.b32.xlu0 %v113_v11, %s143_s13  ;;  %73 = vrot.lane.b32.xlu1 %v114_v12, %s144_s14 }
  0x1a   :  { %79 = vrot.lane.b32.xlu0 %v115_v13, %s145_s19  ;;  %85 = vrot.lane.b32.xlu1 %v116_v14, %s146_s20 }
  0x1e   :  { %91 = vrot.lane.b32.xlu0 %v117_v15, %s147_s0 }
  0x74   :  { %v8_v16 = vpop.permute.xlu0 %7   ;;  %v20_v17 = vpop.permute.xlu1 %19  }
  0x75   :  { %10 = vst.msk [vmem:[#allocation0] sm:$0x1] %vm9_vm1, %v8_v16  }
  0x78   :  { %v14_v18 = vpop.permute.xlu0 %13   ;;  %v26_v19 = vpop.permute.xlu1 %25  }
  0x79   :  { %16 = vst.msk [vmem:[#allocation0] sm:$0x1] %vm15_vm2, %v14_v18  }
  0x7a   :  { %22 = vst.msk [vmem:[#allocation0] sm:$0x1] %vm21_vm3, %v20_v17  }
  0x7b   :  { %28 = vst.msk [vmem:[#allocation0] sm:$0x1] %vm27_vm4, %v26_v19  }
  0x7c   :  { %v32_v20 = vpop.permute.xlu0 %31   ;;  %v38_v21 = vpop.permute.xlu1 %37  }
  0x7d   :  { %34 = vst.msk [vmem:[#allocation0] sm:$0x1] %vm33_vm5, %v32_v20  }
  0x7e   :  { %40 = vst.msk [vmem:[#allocation0] sm:$0x1] %vm39_vm6, %v38_v21  }
  0x80   :  { %v44_v22 = vpop.permute.xlu0 %43   ;;  %v50_v23 = vpop.permute.xlu1 %49  }
  0x81   :  { %46 = vst.msk [vmem:[#allocation0] sm:$0x1] %vm45_vm7, %v44_v22  }
  0x82   :  { %52 = vst.msk [vmem:[#allocation0] sm:$0x1] %vm51_vm8, %v50_v23  }
  0x84   :  { %v56_v24 = vpop.permute.xlu0 %55   ;;  %v62_v25 = vpop.permute.xlu1 %61  }
  0x85   :  { %58 = vst.msk [vmem:[#allocation0] sm:$0x1] %vm57_vm9, %v56_v24  }
  0x86   :  { %64 = vst.msk [vmem:[#allocation0] sm:$0x1] %vm63_vm10, %v62_v25  }
  0x88   :  { %v68_v26 = vpop.permute.xlu0 %67   ;;  %v74_v27 = vpop.permute.xlu1 %73  }
  0x89   :  { %70 = vst.msk [vmem:[#allocation0] sm:$0x1] %vm69_vm11, %v68_v26  }
  0x8a   :  { %76 = vst.msk [vmem:[#allocation0] sm:$0x1] %vm75_vm12, %v74_v27  }
  0x8c   :  { %v80_v28 = vpop.permute.xlu0 %79   ;;  %v86_v29 = vpop.permute.xlu1 %85  }
  0x8d   :  { %82 = vst.msk [vmem:[#allocation0] sm:$0x1] %vm81_vm13, %v80_v28  }
  0x8e   :  { %88 = vst.msk [vmem:[#allocation0] sm:$0x1] %vm87_vm14, %v86_v29  }
  0x90   :  { %v92_v30 = vpop.permute.xlu0 %91  }
  0x91   :  { %94 = vst.msk [vmem:[#allocation0] sm:$0x1] %vm93_vm15, %v92_v30  }
  0x98   :  { %v99_v31 = vld [vmem:[#allocation0] sm:$0x1] }
  0x99   :  { %102 = vst [vmem:[%s210_s1] sm:$0x1] %v99_v31 }

// kernel: double_conv_ds.1
= control target key start
LH: loop header
LB: loop body
LE: loop exit
PB: predicated region body
PF: predicated region fallthrough
CT: control target
= control target key end

     0   :  { %v1220_v3 = vmov 0   ;;  %v30_v4 = vlaneseq  ;;  %s1221_s15 = smov 64   ;;  %vm153_vm2 = vcmask 523264   ;;  %v1222_v38 = vmov 0.0   ;;  %s1697_s0 = inlined_call_operand.vmem [shape: f32[32,64], index: 0, kind: input, shape index: {}]   ;;  %s1698_s1 = inlined_call_operand.vmem [shape: bf16[192,128], index: 1, kind: input, shape index: {}]   ;;  %s1699_s7 = inlined_call_operand.vmem [shape: f32[128,128], index: 7, kind: input, shape index: {}]   ;;  %s1700_s4 = inlined_call_operand.vmem [shape: bf16[384,128], index: 4, kind: input, shape index: {}]   ;;  %s1701_s2 = inlined_call_operand.vmem [shape: f32[1,128], index: 2, kind: input, shape index: {}]   ;;  %s1702_s3 = inlined_call_operand.vmem [shape: f32[1,128], index: 3, kind: input, shape index: {}]   ;;  %s1703_s5 = inlined_call_operand.vmem [shape: f32[1,128], index: 5, kind: input, shape index: {}]   ;;  %s1704_s6 = inlined_call_operand.vmem [shape: f32[1,128], index: 6, kind: input, shape index: {}]   ;;  %s1705_s8 = inlined_call_operand.vmem [shape: f32[32,128], index: 8, kind: output, shape index: {}]  }
   0x1   :  { %v91_v0 = vld [vmem:[%s1697_s0] sm:$0xff]  ;;  %v92_v1 = vld [vmem:[%s1697_s0 + $0x8] sm:$0xff]  ;;  %v93_v2 = vld [vmem:[%s1697_s0 + $0x10] sm:$0xff]  ;;  %264 = vmatprep.subr.bf16.mxu0 %v1220_v3  ;;  %1074 = vmatprep.subr.mxu1 %v1222_v38  ;;  %vm1223_vm7 = vmmov 0   ;;  %vm335_vm8 = vcmask 1040384   ;;  %vm1225_vm9 = vmmov 1  }
   0x2   :  { %v1170_v5 = vpack.i.bf16 %v92_v1, %v91_v0  ;;  %v94_v6 = vld [vmem:[%s1697_s0 + $0x18] sm:$0xff]  ;;  %v117_v8 = vrot.slane %v92_v1, 1  ;;  %v1181_v11 = vld [vmem:[%s1698_s1 + $0x30] sm:$0xff]   ;;  %v1290_v12 = vshrl.u32 %v30_v4, 7  ;;  %v116_v13 = vrot.slane %v91_v0, 1  ;;  %v1182_v16 = vld [vmem:[%s1698_s1 + $0x28] sm:$0xff]   ;;  %1106 = vmatprep.mubr.msk.f32.mxu1 %vm1223_vm7, %v1222_v38 }
   0x3   :  { %v1180_v7 = vld [vmem:[%s1698_s1 + $0x38] sm:$0xff]   ;;  %v119_v9 = vrot.slane %v94_v6, 1  ;;  %v1175_v10 = vpack.i.bf16 %v94_v6, %v93_v2  ;;  %v118_v14 = vrot.slane %v93_v2, 1  ;;  %v96_v20 = vrot.slane %v92_v1, 7  ;;  %v1183_v28 = vld [vmem:[%s1698_s1 + $0x20] sm:$0xff]   ;;  %v1185_v41 = vld [vmem:[%s1698_s1 + $0x10] sm:$0xff]  }
   0x4   :  { %1171 = vrot.lane.b32.xlu0 %v1170_v5, %s1221_s15  ;;  %265 = vmatpush1.bf16.msra.mxu0 %v1180_v7  ;;  %v32_v15 = vadd.s32 8, %v1290_v12  ;;  %vm120_vm0 = vcmp.lt.s32.totalorder %v1290_v12, 7  ;;  %v95_v21 = vrot.slane %v91_v0, 7  ;;  %v98_v24 = vrot.slane %v94_v6, 7  ;;  %v1327_v33 = vld [vmem:[%s1699_s7 + $0x78] sm:$0xff]  ;;  %v1186_v43 = vld [vmem:[%s1698_s1 + $0x8] sm:$0xff]  }
   0x5   :  { %266 = vmatprep.subr.bf16.mxu0 %v1220_v3  ;;  %v122_v18 = vsel %vm120_vm0, %v117_v8, %v118_v14  ;;  %v121_v19 = vsel %vm120_vm0, %v118_v14, %v119_v9  ;;  %v123_v22 = vsel %vm120_vm0, %v116_v13, %v117_v8  ;;  %v124_v23 = vsel %vm120_vm0, %v119_v9, %v116_v13  ;;  %v1184_v36 = vld [vmem:[%s1698_s1 + $0x18] sm:$0xff]   ;;  %v1187_v44 = vld [vmem:[%s1698_s1] sm:$0xff]   ;;  %v1189_v46 = vld [vmem:[%s1698_s1 + $0x50] sm:$0xff]  }
   0x6   :  { %v46_v17 = vand.u32 15, %v32_v15  ;;  %v97_v26 = vrot.slane %v93_v2, 7  ;;  %vm99_vm3 = vcmp.lt.s32.totalorder %v1290_v12, 1  ;;  %v34_v32 = vadd.s32 24, %v1290_v12  ;;  %1075 = vmatpush3.msra.mxu1 %v1327_v33  ;;  %v1188_v45 = vld [vmem:[%s1698_s1 + $0x58] sm:$0xff]   ;;  %v1190_v47 = vld [vmem:[%s1698_s1 + $0x48] sm:$0xff]  }
   0x7   :  { %v102_v30 = vsel %vm99_vm3, %v95_v21, %v96_v20  ;;  %v103_v31 = vsel %vm99_vm3, %v98_v24, %v95_v21  ;;  %1076 = vmatprep.subr.mxu1 %v1222_v38  ;;  %v1191_v48 = vld [vmem:[%s1698_s1 + $0x40] sm:$0xff]   ;;  %v39_v49 = vand.u32 15, %v1290_v12  ;;  %v33_v50 = vadd.s32 16, %v1290_v12  ;;  %v1396_v4 = vld [vmem:[%s1699_s7 + $0x70] sm:$0xff]  ;;  %v1403_v5 = vld [vmem:[%s1699_s7 + $0x68] sm:$0xff] }
   0x8   :  { %1176 = vrot.lane.b32.xlu0 %v1175_v10, %s1221_s15  ;;  %267 = vmatpush1.bf16.msra.mxu0 %v1181_v11  ;;  %vm1307_vm1 = vcmp.ne.s32.totalorder %v46_v17, 15  ;;  %v100_v34 = vsel %vm99_vm3, %v97_v26, %v98_v24  ;;  %v101_v35 = vsel %vm99_vm3, %v96_v20, %v97_v26  ;;  %v60_v37 = vand.u32 15, %v34_v32  ;;  %v1410_v6 = vld [vmem:[%s1699_s7 + $0x60] sm:$0xff]  ;;  %v1417_v7 = vld [vmem:[%s1699_s7 + $0x58] sm:$0xff]  ;;  %v1424_v8 = vld [vmem:[%s1699_s7 + $0x50] sm:$0xff] }
   0x9   :  { %268 = vmatprep.subr.bf16.mxu0 %v1220_v3  ;;  %v134_v27 = vsel %vm1307_vm1, %v122_v18, 0.0  ;;  %vm1376_vm5 = vcmp.ne.s32.totalorder %v39_v49, 0  ;;  %v53_v52 = vand.u32 15, %v33_v50  ;;  %1077 = vmatpush3.msra.mxu1 %v1396_v4  ;;  %v1431_v9 = vld [vmem:[%s1699_s7 + $0x48] sm:$0xff]  ;;  %v1438_v10 = vld [vmem:[%s1699_s7 + $0x40] sm:$0xff]  ;;  %v1445_v11 = vld [vmem:[%s1699_s7 + $0x38] sm:$0xff] }
   0xa   :  { %v159_v29 = vpack.c.bf16 %v134_v27, %v123_v22  ;;  %vm1339_vm4 = vcmp.ne.s32.totalorder %v60_v37, 15  ;;  %v112_v54 = vsel %vm1376_vm5, %v103_v31, 0.0  ;;  %1078 = vmatprep.subr.mxu1 %v1222_v38  ;;  %v1452_v13 = vld [vmem:[%s1699_s7 + $0x30] sm:$0xff]  ;;  %v1459_v14 = vld [vmem:[%s1699_s7 + $0x28] sm:$0xff]  ;;  %v1466_v15 = vld [vmem:[%s1699_s7 + $0x20] sm:$0xff] }
   0xb   :  { %v136_v40 = vsel %vm1339_vm4, %v124_v23, 0.0  ;;  %vm1382_vm6 = vcmp.ne.s32.totalorder %v53_v52, 0  ;;  %1079 = vmatpush3.msra.mxu1 %v1403_v5  ;;  %v1478_v17 = vld [vmem:[%s1699_s7 + $0x10] sm:$0xff]  ;;  %v1487_v18 = vld [vmem:[%s1699_s7 + $0x8] sm:$0xff]  ;;  %vm990_vm10 = vmpackc.low %vm1225_vm9, %vm1376_vm5 }
   0xc   :  { %269 = vmatpush1.bf16.msra.mxu0 %v1182_v16  ;;  %964 = vmatprep.mubr.msk.bf16.mxu0 %vm153_vm2, %v159_v29  ;;  %v161_v42 = vpack.c.bf16 %v136_v40, %v121_v19  ;;  %v114_v62 = vsel %vm1382_vm6, %v101_v35, 0.0  ;;  %v1472_v16 = vld [vmem:[%s1699_s7 + $0x18] sm:$0xff]  ;;  %v1494_v19 = vld [vmem:[%s1699_s7] sm:$0xff]  ;;  %vm996_vm11 = vmpackc.low %vm1307_vm1, %vm1225_vm9 }
   0xd   :  { %270 = vmatprep.subr.bf16.mxu0 %v1220_v3  ;;  %1080 = vmatprep.subr.mxu1 %v1222_v38  ;;  %vm999_vm12 = vmpackc.low %vm1339_vm4, %vm1225_vm9 }
   0xe   :  { %1081 = vmatpush3.msra.mxu1 %v1410_v6  ;;  %vm993_vm13 = vmpackc.low %vm1225_vm9, %vm1382_vm6 }
   0xf   :  { %1082 = vmatprep.subr.mxu1 %v1222_v38 }
  0x10   :  { %271 = vmatpush1.bf16.msra.mxu0 %v1183_v28  ;;  %1083 = vmatpush3.msra.mxu1 %v1417_v7 }
  0x11   :  { %272 = vmatprep.subr.bf16.mxu0 %v1220_v3  ;;  %1084 = vmatprep.subr.mxu1 %v1222_v38 }
  0x12   :  { %1085 = vmatpush3.msra.mxu1 %v1424_v8 }
  0x13   :  { %1086 = vmatprep.subr.mxu1 %v1222_v38 }
  0x14   :  { %273 = vmatpush1.bf16.msra.mxu0 %v1184_v36  ;;  %1087 = vmatpush3.msra.mxu1 %v1431_v9 }
  0x15   :  { %274 = vmatprep.subr.bf16.mxu0 %v1220_v3  ;;  %1088 = vmatprep.subr.mxu1 %v1222_v38 }
  0x16   :  { %1089 = vmatpush3.msra.mxu1 %v1438_v10 }
  0x17   :  { %1090 = vmatprep.subr.mxu1 %v1222_v38 }
  0x18   :  { %275 = vmatpush1.bf16.msra.mxu0 %v1185_v41  ;;  %1091 = vmatpush3.msra.mxu1 %v1445_v11 }
  0x19   :  { %276 = vmatprep.subr.bf16.mxu0 %v1220_v3  ;;  %1092 = vmatprep.subr.mxu1 %v1222_v38 }
  0x1a   :  { %1093 = vmatpush3.msra.mxu1 %v1452_v13 }
  0x1b   :  { %1094 = vmatprep.subr.mxu1 %v1222_v38 }
  0x1c   :  { %277 = vmatpush1.bf16.msra.mxu0 %v1186_v43  ;;  %1095 = vmatpush3.msra.mxu1 %v1459_v14 }
  0x1d   :  { %278 = vmatprep.subr.bf16.mxu0 %v1220_v3  ;;  %1096 = vmatprep.subr.mxu1 %v1222_v38 }
  0x1e   :  { %1097 = vmatpush3.msra.mxu1 %v1466_v15 }
  0x1f   :  { %1098 = vmatprep.subr.mxu1 %v1222_v38 }
  0x20   :  { %279 = vmatpush1.bf16.msra.mxu0 %v1187_v44  ;;  %1099 = vmatpush3.msra.mxu1 %v1472_v16 }
  0x21   :  { %288 = vmatprep.subr.bf16.mxu0 %v1220_v3  ;;  %1100 = vmatprep.subr.mxu1 %v1222_v38 }
  0x22   :  { %1101 = vmatpush3.msra.mxu1 %v1478_v17 }
  0x23   :  { %1102 = vmatprep.subr.mxu1 %v1222_v38 }
  0x24   :  { %289 = vmatpush2.bf16.msra.mxu0 %v1188_v45  ;;  %1103 = vmatpush3.msra.mxu1 %v1487_v18 }
  0x25   :  { %290 = vmatprep.subr.bf16.mxu0 %v1220_v3  ;;  %1104 = vmatprep.subr.mxu1 %v1222_v38 }
  0x26   :  { %1105 = vmatpush3.msra.mxu1 %v1494_v19 }
  0x28   :  { %291 = vmatpush2.bf16.msra.mxu0 %v1189_v46 }
  0x29   :  { %292 = vmatprep.subr.bf16.mxu0 %v1220_v3 }
  0x2c   :  { %293 = vmatpush2.bf16.msra.mxu0 %v1190_v47 }
  0x2d   :  { %294 = vmatprep.subr.bf16.mxu0 %v1220_v3 }
  0x30   :  { %295 = vmatpush2.bf16.msra.mxu0 %v1191_v48 }
  0x76   :  { %v1172_v53 = vpop.permute.xlu0 %1171 }
  0x77   :  { %v1174_v55 = vunpack.i.h.bf16 %v1172_v53  ;;  %v1173_v56 = vunpack.i.l.bf16 %v1172_v53 }
  0x79   :  { %v154_v58 = vsel %vm153_vm2, %v112_v54, %v1173_v56  ;;  %v155_v59 = vsel %vm153_vm2, %v102_v30, %v1174_v55  ;;  %v1192_v56 = vld [vmem:[%s1700_s4 + $0x78] sm:$0xff]  }
  0x7a   :  { %v158_v60 = vpack.c.bf16 %v155_v59, %v154_v58  ;;  %v1177_v61 = vpop.permute.xlu0 %1176  ;;  %v1193_v58 = vld [vmem:[%s1700_s4 + $0x38] sm:$0xff]   ;;  %1019 = vmatprep.subr.bf16.mxu1 %v1192_v56  ;;  %v429_v56 = vld [vmem:[%s1701_s2] sm:$0x1] }
  0x7b   :  { %v1179_v63 = vunpack.i.h.bf16 %v1177_v61  ;;  %v1178_v0 = vunpack.i.l.bf16 %v1177_v61  ;;  %v1194_v59 = vld [vmem:[%s1700_s4 + $0xb8] sm:$0xff]   ;;  %v1196_v61 = vld [vmem:[%s1700_s4 + $0x30] sm:$0xff]  }
  0x7c   :  { %297 = vmatmul.mubr.bf16.vlgmr.msra.gmra.mxu0 %v158_v60  ;;  %1109 = vmatprep.subr.bf16.mxu0 %v1194_v59  ;;  %v1195_v60 = vld [vmem:[%s1700_s4 + $0x70] sm:$0xff]  }
  0x7d   :  { %965 = vmatprep.mubr.msk.bf16.mxu0 %vm153_vm2, %v161_v42  ;;  %v156_v1 = vsel %vm153_vm2, %v114_v62, %v1178_v0  ;;  %v157_v2 = vsel %vm153_vm2, %v100_v34, %v1179_v63  ;;  %1110 = vmatpush3.bf16.msra.mxu0 %v1194_v59  ;;  %v1197_v62 = vld [vmem:[%s1700_s4 + $0xb0] sm:$0xff]   ;;  %v1198_v63 = vld [vmem:[%s1700_s4 + $0x68] sm:$0xff]   ;;  %v1602_v59 = vsub.s32 0, %v1290_v12 }
  0x7e   :  { %v160_v3 = vpack.c.bf16 %v157_v2, %v156_v1  ;;  %1111 = vmatprep.subr.bf16.mxu0 %v1197_v62  ;;  %v1199_v0 = vld [vmem:[%s1700_s4 + $0x28] sm:$0xff]   ;;  %v1201_v2 = vld [vmem:[%s1700_s4 + $0x60] sm:$0xff]  }
  0x7f   :  { %v1200_v1 = vld [vmem:[%s1700_s4 + $0xa8] sm:$0xff]  }
  0x81   :  { %1112 = vmatpush3.bf16.msra.mxu0 %v1197_v62 }
  0x82   :  { %1113 = vmatprep.subr.bf16.mxu0 %v1200_v1 }
  0x84   :  { %305 = vmatmul.mubr.bf16.gmra.mxu0 %v160_v3  ;;  %v1202_v3 = vld [vmem:[%s1700_s4 + $0x20] sm:$0xff]  }
  0x85   :  { %1114 = vmatpush3.bf16.msra.mxu0 %v1200_v1 }
 0x13c   :  { %v1499_v20 = vpop.f32.mrf.mxu0 }
 0x13d   :  { %v322_v27 = vmul.f32 %v1499_v20, %v1499_v20 }
 0x13e   :  { %v300_v21 = vpop.f32.mrf.mxu0 }
 0x13f   :  { %v1203_v21 = vld [vmem:[%s1700_s4 + $0xa0] sm:$0xff]  }
 0x140   :  { %v1501_v22 = vpop.f32.mrf.mxu0  ;;  %1115 = vmatprep.subr.bf16.mxu0 %v1203_v21 }
 0x141   :  { %v323_v24 = vmul.f32 %v1501_v22, %v1501_v22  ;;  %v313_v28 = vadd.f32 %v1501_v22, %v1499_v20  ;;  %1116 = vmatpush3.bf16.msra.mxu0 %v1203_v21 }
 0x142   :  { %v303_v23 = vpop.f32.mrf.mxu0 }
 0x143   :  { %v326_v31 = vadd.f32 %v323_v24, %v322_v27  ;;  %v1204_v23 = vld [vmem:[%s1700_s4 + $0x58] sm:$0xff]  }
 0x144   :  { %v1505_v26 = vpop.f32.mrf.mxu0  ;;  %v1205_v24 = vld [vmem:[%s1700_s4 + $0x18] sm:$0xff]  }
 0x145   :  { %v324_v29 = vmul.f32 %v1505_v26, %v1505_v26  ;;  %v314_v32 = vadd.f32 %v313_v28, %v1505_v26  ;;  %v1206_v27 = vld [vmem:[%s1700_s4 + $0x98] sm:$0xff]   ;;  %v1207_v28 = vld [vmem:[%s1700_s4 + $0x50] sm:$0xff]  }
 0x146   :  { %v308_v30 = vpop.f32.mrf.mxu0  ;;  %1117 = vmatprep.subr.bf16.mxu0 %v1206_v27 }
 0x147   :  { %v327_v35 = vadd.f32 %v326_v31, %v324_v29  ;;  %1118 = vmatpush3.bf16.msra.mxu0 %v1206_v27  ;;  %v1208_v29 = vld [vmem:[%s1700_s4 + $0x10] sm:$0xff]   ;;  %v1210_v31 = vld [vmem:[%s1700_s4 + $0x48] sm:$0xff]  }
 0x148   :  { %v1514_v34 = vpop.f32.mrf.mxu0  ;;  %v1209_v30 = vld [vmem:[%s1700_s4 + $0x90] sm:$0xff]  }
 0x149   :  { %v315_v36 = vadd.f32 %v314_v32, %v1514_v34  ;;  %v325_v37 = vmul.f32 %v1514_v34, %v1514_v34  ;;  %1119 = vmatprep.subr.bf16.mxu0 %v1209_v30  ;;  %v1211_v32 = vld [vmem:[%s1700_s4 + $0x8] sm:$0xff]  }
 0x14a   :  { %v311_v40 = vpop.f32.mrf.mxu0 }
 0x14b   :  { %v316_v41 = vrot.slane %v315_v36, 4  ;;  %v328_v42 = vadd.f32 %v327_v35, %v325_v37  ;;  %1120 = vmatpush3.bf16.msra.mxu0 %v1209_v30  ;;  %v1212_v35 = vld [vmem:[%s1700_s4 + $0x88] sm:$0xff]   ;;  %v1214_v37 = vld [vmem:[%s1700_s4] sm:$0xff]  }
 0x14c   :  { %1121 = vmatprep.subr.bf16.mxu0 %v1212_v35  ;;  %v1215_v40 = vld [vmem:[%s1700_s4 + $0x80] sm:$0xff]  }
 0x14d   :  { %v317_v43 = vadd.f32 %v316_v41, %v315_v36  ;;  %v329_v44 = vrot.slane %v328_v42, 4  ;;  %v1213_v36 = vld [vmem:[%s1700_s4 + $0x40] sm:$0xff]  }
 0x14f   :  { %v318_v45 = vrot.slane %v317_v43, 2  ;;  %v330_v46 = vadd.f32 %v329_v44, %v328_v42  ;;  %1122 = vmatpush3.bf16.msra.mxu0 %v1212_v35 }
 0x150   :  { %1123 = vmatprep.subr.bf16.mxu0 %v1215_v40 }
 0x151   :  { %v319_v47 = vadd.f32 %v318_v45, %v317_v43  ;;  %v331_v48 = vrot.slane %v330_v46, 2 }
 0x153   :  { %v320_v49 = vrot.slane %v319_v47, 1  ;;  %v332_v50 = vadd.f32 %v331_v48, %v330_v46  ;;  %1124 = vmatpush3.bf16.msra.mxu0 %v1215_v40  ;;  %v1224_v48 = vmov 1966171168  }
 0x155   :  { %v333_v52 = vrot.slane %v332_v50, 1  ;;  %v321_v53 = vadd.f32 %v320_v49, %v319_v47  ;;  %v434_v49 = vunpack.c.l.s4 %v1224_v48 }
 0x157   :  { %v334_v54 = vadd.f32 %v333_v52, %v332_v50  ;;  %v435_v50 = vunpack.c.0.s8 %v434_v49 }
 0x159   :  { %v336_v55 = vsel %vm335_vm8, %v321_v53, %v334_v54  ;;  %v1594_v52 = vsub.s32 %v435_v50, %v1290_v12 }
 0x15a   :  { %1107 = vmatmul.mubr.f32.vlgmr.msra.gmra.mxu1 %v336_v55 }
 0x15b   :  { %1020 = vmatpush3.bf16.msra.mxu1 %v1193_v58 }
 0x15c   :  { %1021 = vmatprep.subr.bf16.mxu1 %v1195_v60 }
 0x15f   :  { %1022 = vmatpush3.bf16.msra.mxu1 %v1196_v61  ;;  %v450_v61 = vld [vmem:[%s1702_s3] sm:$0x1] }
 0x160   :  { %1023 = vmatprep.subr.bf16.mxu1 %v1198_v63 }
 0x163   :  { %1024 = vmatpush3.bf16.msra.mxu1 %v1199_v0 }
 0x164   :  { %1025 = vmatprep.subr.bf16.mxu1 %v1201_v2 }
 0x167   :  { %1026 = vmatpush3.bf16.msra.mxu1 %v1202_v3 }
 0x168   :  { %1027 = vmatprep.subr.bf16.mxu1 %v1204_v23 }
 0x16b   :  { %1028 = vmatpush3.bf16.msra.mxu1 %v1205_v24 }
 0x16c   :  { %1029 = vmatprep.subr.bf16.mxu1 %v1207_v28 }
 0x16f   :  { %1030 = vmatpush3.bf16.msra.mxu1 %v1208_v29 }
 0x170   :  { %1031 = vmatprep.subr.bf16.mxu1 %v1210_v31 }
 0x173   :  { %1032 = vmatpush3.bf16.msra.mxu1 %v1211_v32 }
 0x174   :  { %1033 = vmatprep.subr.bf16.mxu1 %v1213_v36 }
 0x177   :  { %1034 = vmatpush3.bf16.msra.mxu1 %v1214_v37 }
 0x178   :  { %1129 = vmatprep.subr.mxu1 %v1222_v38 }
 0x21a   :  { %v419_v41 = vpop.f32.mrf.mxu1 }
 0x21b   :  { %v423_v42 = vmul.f32 %v419_v41, %v419_v41 }
 0x21c   :  { %v1108_v43 = vpop.f32.mrf.mxu1 }
 0x21d   :  { %v425_v44 = vrot.slane %v423_v42, 7 }
 0x21f   :  { %v427_v45 = vsub.f32 %v419_v41, %v425_v44 }
 0x221   :  { %v428_v46 = vmax.f32 %v427_v45, 0.0 }
 0x223   :  { %v430_v47 = vadd.f32 1e-05, %v428_v46 }
 0x225   :  { %1216 = vrsqrt.f32 %v430_v47 }
 0x232   :  { %v1217_v53 = vpop.eup %1216 }
 0x233   :  { %v439_v54 = vrot.slane %v1217_v53, %v1594_v52 }
 0x235   :  { %v440_v55 = vcombine.high %v439_v54, %v439_v54 }
 0x237   :  { %v447_v58 = vrot.slane %v440_v55, %v1594_v52 }
 0x239   :  { %v449_v60 = vmul.f32 %v447_v58, %v429_v56 }
 0x23b   :  { %v451_v62 = vmul.f32 %v449_v60, %v419_v41  ;;  %v457_v63 = vrot.slane %v449_v60, %v1602_v59 }
 0x23d   :  { %v452_v0 = vsub.f32 %v450_v61, %v451_v62  ;;  %v461_v1 = vmul.f32 %v457_v63, %v1505_v26  ;;  %v462_v2 = vmul.f32 %v457_v63, %v1514_v34  ;;  %v459_v21 = vmul.f32 %v457_v63, %v1499_v20 }
 0x23e   :  { %v460_v23 = vmul.f32 %v457_v63, %v1501_v22 }
 0x23f   :  { %v467_v3 = vrot.slane %v452_v0, %v1602_v59 }
 0x241   :  { %v471_v24 = vadd.f32 %v467_v3, %v461_v1  ;;  %v472_v27 = vadd.f32 %v467_v3, %v462_v2  ;;  %v469_v28 = vadd.f32 %v467_v3, %v459_v21  ;;  %v470_v29 = vadd.f32 %v467_v3, %v460_v23 }
 0x243   :  { %v475_v30 = vmax.f32 %v471_v24, 0.0  ;;  %v476_v31 = vmax.f32 %v472_v27, 0.0  ;;  %v473_v32 = vmax.f32 %v469_v28, 0.0  ;;  %v474_v35 = vmax.f32 %v470_v29, 0.0 }
 0x245   :  { %v492_v36 = vrot.slane %v476_v31, 1  ;;  %v477_v37 = vrot.slane %v473_v32, 7  ;;  %v478_v40 = vrot.slane %v474_v35, 7  ;;  %v502_v26 = vpack.c.bf16 %v474_v35, %v473_v32 }
 0x246   :  { %v480_v41 = vrot.slane %v476_v31, 7  ;;  %v489_v34 = vrot.slane %v473_v32, 1  ;;  %v490_v42 = vrot.slane %v474_v35, 1  ;;  %v491_v43 = vrot.slane %v475_v30, 1 }
 0x247   :  { %731 = vmatprep.mubr.bf16.mxu1 %v502_v26  ;;  %v483_v20 = vsel %vm99_vm3, %v477_v37, %v478_v40  ;;  %v505_v49 = vpack.c.bf16 %v476_v31, %v475_v30  ;;  %v479_v53 = vrot.slane %v475_v30, 7 }
 0x248   :  { %v484_v22 = vsel %vm99_vm3, %v480_v41, %v477_v37  ;;  %v493_v44 = vsel %vm120_vm0, %v491_v43, %v492_v36  ;;  %v494_v45 = vsel %vm120_vm0, %v490_v42, %v491_v43  ;;  %v495_v46 = vsel %vm120_vm0, %v489_v34, %v490_v42 }
 0x249   :  { %v991_v47 = vpack.c.bf16 %v483_v20, %v484_v22  ;;  %v496_v51 = vsel %vm120_vm0, %v492_v36, %v489_v34  ;;  %v997_v48 = vpack.c.bf16 %v494_v45, %v495_v46  ;;  %v481_v25 = vsel %vm99_vm3, %v479_v53, %v480_v41 }
 0x24a   :  { %v1000_v50 = vpack.c.bf16 %v496_v51, %v493_v44  ;;  %v482_v54 = vsel %vm99_vm3, %v478_v40, %v479_v53 }
 0x24b   :  { %992 = vmatmul.mubr.msk.bf16.vlgmr.msra.gmra.mxu1 %vm990_vm10, %v991_v47  ;;  %1125 = vmatprep.mubr.msk.bf16.mxu0 %vm996_vm11, %v997_v48  ;;  %v994_v39 = vpack.c.bf16 %v481_v25, %v482_v54  ;;  %v896_v47 = vld [vmem:[%s1703_s5] sm:$0x1] }
 0x24c   :  { %739 = vmatprep.mubr.bf16.mxu1 %v505_v49  ;;  %1126 = vmatmul.mubr.msk.bf16.vlgmr.msra.gmra.mxu0 %vm999_vm12, %v1000_v50  ;;  %v917_v49 = vld [vmem:[%s1704_s6] sm:$0x1] }
 0x24d   :  { %1130 = vmatpush3.msra.mxu1 %v1327_v33 }
 0x24e   :  { %1131 = vmatprep.subr.mxu1 %v1222_v38 }
 0x24f   :  { %1132 = vmatpush3.msra.mxu1 %v1396_v4 }
 0x250   :  { %1133 = vmatprep.subr.mxu1 %v1222_v38 }
 0x251   :  { %1134 = vmatpush3.msra.mxu1 %v1403_v5 }
 0x252   :  { %1135 = vmatprep.subr.mxu1 %v1222_v38 }
 0x253   :  { %995 = vmatmul.mubr.msk.bf16.gmra.mxu1 %vm993_vm13, %v994_v39 }
 0x254   :  { %1136 = vmatpush3.msra.mxu1 %v1410_v6  ;;  %1161 = vmatprep.mubr.msk.f32.mxu1 %vm1223_vm7, %v1222_v38 }
 0x255   :  { %1137 = vmatprep.subr.mxu1 %v1222_v38 }
 0x256   :  { %1138 = vmatpush3.msra.mxu1 %v1417_v7 }
 0x257   :  { %1139 = vmatprep.subr.mxu1 %v1222_v38 }
 0x258   :  { %1140 = vmatpush3.msra.mxu1 %v1424_v8 }
 0x259   :  { %1141 = vmatprep.subr.mxu1 %v1222_v38 }
 0x25a   :  { %1142 = vmatpush3.msra.mxu1 %v1431_v9 }
 0x25b   :  { %1143 = vmatprep.subr.mxu1 %v1222_v38 }
 0x25c   :  { %1144 = vmatpush3.msra.mxu1 %v1438_v10 }
 0x25d   :  { %1145 = vmatprep.subr.mxu1 %v1222_v38 }
 0x25e   :  { %1146 = vmatpush3.msra.mxu1 %v1445_v11 }
 0x25f   :  { %1147 = vmatprep.subr.mxu1 %v1222_v38 }
 0x260   :  { %1148 = vmatpush3.msra.mxu1 %v1452_v13 }
 0x261   :  { %1149 = vmatprep.subr.mxu1 %v1222_v38 }
 0x262   :  { %1150 = vmatpush3.msra.mxu1 %v1459_v14 }
 0x263   :  { %1151 = vmatprep.subr.mxu1 %v1222_v38 }
 0x264   :  { %1152 = vmatpush3.msra.mxu1 %v1466_v15 }
 0x265   :  { %1153 = vmatprep.subr.mxu1 %v1222_v38 }
 0x266   :  { %1154 = vmatpush3.msra.mxu1 %v1472_v16 }
 0x267   :  { %1155 = vmatprep.subr.mxu1 %v1222_v38 }
 0x268   :  { %1156 = vmatpush3.msra.mxu1 %v1478_v17 }
 0x269   :  { %1157 = vmatprep.subr.mxu1 %v1222_v38 }
 0x26a   :  { %1158 = vmatpush3.msra.mxu1 %v1487_v18 }
 0x26b   :  { %1159 = vmatprep.subr.mxu1 %v1222_v38 }
 0x26c   :  { %1160 = vmatpush3.msra.mxu1 %v1494_v19 }
 0x30b   :  { %v1035_v12 = vpop.f32.mrf.mxu1 }
 0x30c   :  { %v1127_v33 = vpop.f32.mrf.mxu0 }
 0x30d   :  { %v1036_v57 = vpop.f32.mrf.mxu1 }
 0x30e   :  { %v782_v4 = vpop.f32.mrf.mxu0  ;;  %v1037_v8 = vadd.f32 %v1036_v57, %v1035_v12 }
 0x30f   :  { %v1038_v5 = vpop.f32.mrf.mxu1 }
 0x310   :  { %v1128_v6 = vpop.f32.mrf.mxu0  ;;  %v783_v15 = vadd.f32 %v1037_v8, %v782_v4 }
 0x311   :  { %v1039_v7 = vpop.f32.mrf.mxu1 }
 0x312   :  { %v1040_v9 = vadd.f32 %v1039_v7, %v1038_v5  ;;  %v785_v10 = vpop.f32.mrf.mxu0  ;;  %v806_v19 = vmul.f32 %v783_v15, %v783_v15 }
 0x313   :  { %v1041_v11 = vpop.f32.mrf.mxu1 }
 0x314   :  { %v786_v13 = vadd.f32 %v1040_v9, %v785_v10 }
 0x315   :  { %v1042_v14 = vpop.f32.mrf.mxu1 }
 0x316   :  { %v1043_v16 = vadd.f32 %v1042_v14, %v1041_v11  ;;  %v807_v18 = vmul.f32 %v786_v13, %v786_v13  ;;  %v797_v56 = vadd.f32 %v786_v13, %v783_v15 }
 0x317   :  { %v1044_v17 = vpop.f32.mrf.mxu1 }
 0x318   :  { %v791_v38 = vadd.f32 %v1127_v33, %v1043_v16  ;;  %v810_v61 = vadd.f32 %v807_v18, %v806_v19 }
 0x319   :  { %v1045_v55 = vpop.f32.mrf.mxu1 }
 0x31a   :  { %v808_v58 = vmul.f32 %v791_v38, %v791_v38  ;;  %v1046_v60 = vadd.f32 %v1045_v55, %v1044_v17  ;;  %v798_v62 = vadd.f32 %v797_v56, %v791_v38 }
 0x31c   :  { %v794_v63 = vadd.f32 %v1128_v6, %v1046_v60  ;;  %v811_v0 = vadd.f32 %v810_v61, %v808_v58 }
 0x31e   :  { %v799_v1 = vadd.f32 %v798_v62, %v794_v63  ;;  %v809_v2 = vmul.f32 %v794_v63, %v794_v63 }
 0x320   :  { %v800_v3 = vrot.slane %v799_v1, 4  ;;  %v812_v21 = vadd.f32 %v811_v0, %v809_v2 }
 0x322   :  { %v801_v23 = vadd.f32 %v800_v3, %v799_v1  ;;  %v813_v24 = vrot.slane %v812_v21, 4 }
 0x324   :  { %v802_v27 = vrot.slane %v801_v23, 2  ;;  %v814_v28 = vadd.f32 %v813_v24, %v812_v21 }
 0x326   :  { %v803_v29 = vadd.f32 %v802_v27, %v801_v23  ;;  %v815_v30 = vrot.slane %v814_v28, 2 }
 0x328   :  { %v804_v31 = vrot.slane %v803_v29, 1  ;;  %v816_v32 = vadd.f32 %v815_v30, %v814_v28 }
 0x32a   :  { %v817_v35 = vrot.slane %v816_v32, 1  ;;  %v805_v36 = vadd.f32 %v804_v31, %v803_v29 }
 0x32c   :  { %v818_v37 = vadd.f32 %v817_v35, %v816_v32 }
 0x32e   :  { %v819_v40 = vsel %vm335_vm8, %v805_v36, %v818_v37 }
 0x32f   :  { %1162 = vmatmul.mubr.f32.vlgmr.msra.gmra.mxu1 %v819_v40 }
 0x3ef   :  { %v886_v26 = vpop.f32.mrf.mxu1 }
 0x3f0   :  { %v890_v41 = vmul.f32 %v886_v26, %v886_v26 }
 0x3f1   :  { %v1163_v34 = vpop.f32.mrf.mxu1 }
 0x3f2   :  { %v892_v42 = vrot.slane %v890_v41, 7 }
 0x3f4   :  { %v894_v43 = vsub.f32 %v886_v26, %v892_v42 }
 0x3f6   :  { %v895_v20 = vmax.f32 %v894_v43, 0.0 }
 0x3f8   :  { %v897_v22 = vadd.f32 1e-05, %v895_v20 }
 0x3fa   :  { %1218 = vrsqrt.f32 %v897_v22 }
 0x407   :  { %v1219_v44 = vpop.eup %1218 }
 0x408   :  { %v906_v45 = vrot.slane %v1219_v44, %v1594_v52 }
 0x40a   :  { %v907_v46 = vcombine.high %v906_v45, %v906_v45 }
 0x40c   :  { %v914_v51 = vrot.slane %v907_v46, %v1594_v52 }
 0x40e   :  { %v916_v48 = vmul.f32 %v914_v51, %v896_v47 }
 0x410   :  { %v918_v50 = vmul.f32 %v916_v48, %v886_v26  ;;  %v924_v53 = vrot.slane %v916_v48, %v1602_v59 }
 0x412   :  { %v919_v25 = vsub.f32 %v917_v49, %v918_v50  ;;  %v926_v54 = vmul.f32 %v924_v53, %v783_v15  ;;  %v927_v39 = vmul.f32 %v924_v53, %v786_v13  ;;  %v928_v12 = vmul.f32 %v924_v53, %v791_v38 }
 0x413   :  { %v929_v33 = vmul.f32 %v924_v53, %v794_v63 }
 0x414   :  { %v934_v57 = vrot.slane %v919_v25, %v1602_v59 }
 0x416   :  { %v936_v4 = vadd.f32 %v934_v57, %v926_v54  ;;  %v937_v5 = vadd.f32 %v934_v57, %v927_v39  ;;  %v938_v6 = vadd.f32 %v934_v57, %v928_v12  ;;  %v939_v7 = vadd.f32 %v934_v57, %v929_v33 }
 0x418   :  { %v940_v52 = vmax.f32 %v936_v4, 0.0  ;;  %v941_v8 = vmax.f32 %v937_v5, 0.0  ;;  %v942_v9 = vmax.f32 %v938_v6, 0.0  ;;  %v943_v10 = vmax.f32 %v939_v7, 0.0 }
 0x41a   :  { %944 = vst [vmem:[%s1705_s8] sm:$0xff] %v940_v52  ;;  %945 = vst [vmem:[%s1705_s8 + $0x8] sm:$0xff] %v941_v8 }
 0x41b   :  { %946 = vst [vmem:[%s1705_s8 + $0x10] sm:$0xff] %v942_v9  ;;  %947 = vst [vmem:[%s1705_s8 + $0x18] sm:$0xff] %v943_v10 }

</bundles_post_ra>
